<compile_context>
chip_gen: v7x
topology: tpu7x:2x2x1
jax: 0.10.0
libtpu: 0.0.40
codegen_flags: <defaults>
</compile_context>

<pallas_src>
import jax
import jax.numpy as jnp
from jax.experimental import pallas as pl
from jax.experimental.pallas import tpu as pltpu


def _round_up(n, m):
    return ((n + m - 1) // m) * m


def _choose_tile_b(B, requested):
    """Lane-aligned batch tile: multiple of 128, <= (128-rounded) batch, and
    small enough that the grid has >=2 steps whenever the batch allows it
    (so dimension_semantics=('parallel',) can shard across v7x's 2 TCs)."""
    t = _round_up(max(requested, 128), 128)
    b128 = _round_up(B, 128)
    t = min(t, b128)
    if b128 >= 256:
        t = min(t, _round_up((B + 1) // 2, 128))
    return t


def mlp_kernel(x_ref, w1_ref, b1_ref, w2_ref, b2_ref, w3t_ref, b3_ref, o_ref):
    cdt = w1_ref.dtype  # MXU input dtype (bf16 or f32); accumulation is always f32.

    # x arrives as f32 straight from HBM; cast to the compute dtype on the VPU.
    x = x_ref[...].astype(cdt)

    # Linear(input_dim, 128) + ReLU  (bias add / ReLU in f32 on the VPU)
    h1 = jnp.dot(x, w1_ref[...], preferred_element_type=jnp.float32)
    h1 = jnp.maximum(h1 + b1_ref[...], 0.0)
    # Dropout(0.2): identity in eval mode.
    # TODO(synk): training-mode dropout (pltpu.prng_random_bits mask + 1/(1-p) scale).

    # Linear(128, 128) + ReLU
    h2 = jnp.dot(h1.astype(cdt), w2_ref[...], preferred_element_type=jnp.float32)
    h2 = jnp.maximum(h2 + b2_ref[...], 0.0)
    # Dropout(0.2): identity in eval mode.

    # Linear(128, 1), computed lane-dense:
    #   (1, H) contracted with (tile_b, H) on H -> (1, tile_b), so the output
    #   block writes full 128-lane rows (unmasked vst) instead of a (tile_b, 1)
    #   column of masked stores.
    out = jax.lax.dot_general(
        w3t_ref[...], h2.astype(cdt),
        dimension_numbers=(((1,), (1,)), ((), ())),
        preferred_element_type=jnp.float32,
    )
    o_ref[...] = (out + b3_ref[0, 0]).astype(o_ref.dtype)


def mlp_forward(x, params, *, tile_b=2048, compute_dtype=jnp.bfloat16,
                vmem_limit_bytes=32 * 1024 * 1024):
    """Fused MLP forward. x: (B, D) float32. Returns (B, 1) float32."""
    w1, b1, w2, b2, w3, b3 = params
    B, D = x.shape
    H = w1.shape[1]  # 128

    tile_b = _choose_tile_b(B, tile_b)

    x = x.astype(jnp.float32)          # no-op for f32 inputs; kernel casts to bf16
    if B < tile_b:                      # only tiny batches get padded (B < 128)
        x = jnp.pad(x, ((0, tile_b - B), (0, 0)))

    n_steps = pl.cdiv(B, tile_b)
    out_cols = n_steps * tile_b         # padded output buffer only; no x pad/copy

    w1c = w1.astype(compute_dtype)
    w2c = w2.astype(compute_dtype)
    w3t = w3.reshape(1, H).astype(compute_dtype)   # (H, 1) -> lane-major (1, H)
    b1f = b1.reshape(1, H).astype(jnp.float32)
    b2f = b2.reshape(1, H).astype(jnp.float32)
    b3s = b3.reshape(1, 1).astype(jnp.float32)     # scalar bias -> SMEM

    flops = 2 * B * (D * H + H * H + H * 1)
    bytes_accessed = (
        B * D * 4                                   # x read once, f32
        + w1c.size * w1c.dtype.itemsize
        + w2c.size * w2c.dtype.itemsize
        + w3t.size * w3t.dtype.itemsize
        + (2 * H + 1) * 4                           # biases
        + out_cols * 4                              # output
    )

    out_row = pl.pallas_call(
        mlp_kernel,
        out_shape=jax.ShapeDtypeStruct((1, out_cols), jnp.float32),
        grid_spec=pltpu.PrefetchScalarGridSpec(
            num_scalar_prefetch=0,
            grid=(n_steps,),
            in_specs=[
                pl.BlockSpec((tile_b, D), lambda i: (i, 0)),        # x f32, batch-tiled
                pl.BlockSpec((D, H), lambda i: (0, 0)),             # w1 (resident)
                pl.BlockSpec((1, H), lambda i: (0, 0)),             # b1
                pl.BlockSpec((H, H), lambda i: (0, 0)),             # w2 (resident)
                pl.BlockSpec((1, H), lambda i: (0, 0)),             # b2
                pl.BlockSpec((1, H), lambda i: (0, 0)),             # w3^T (resident)
                pl.BlockSpec(memory_space=pltpu.MemorySpace.SMEM),  # b3 scalar
            ],
            out_specs=pl.BlockSpec((1, tile_b), lambda i: (0, i)),  # lane-dense out
        ),
        compiler_params=pltpu.CompilerParams(
            dimension_semantics=("parallel",),        # megacore sharding on v7x
            vmem_limit_bytes=vmem_limit_bytes,        # headroom for big tiles (v5e)
        ),
        cost_estimate=pl.CostEstimate(
            flops=flops, transcendentals=0, bytes_accessed=bytes_accessed),
    )(x, w1c, b1f, w2c, b2f, w3t, b3s)

    return out_row[0, :B].reshape(B, 1)


def init_params(key, input_dim, hidden=128, out_dim=1):
    """Deterministic synthetic init (PyTorch-style uniform +/- 1/sqrt(fan_in))."""
    ks = jax.random.split(key, 6)

    def lin(kw, kb, fan_in, fan_out):
        bound = 1.0 / jnp.sqrt(float(fan_in))
        w = jax.random.uniform(kw, (fan_in, fan_out), jnp.float32, -bound, bound)
        b = jax.random.uniform(kb, (1, fan_out), jnp.float32, -bound, bound)
        return w, b

    w1, b1 = lin(ks[0], ks[1], input_dim, hidden)
    w2, b2 = lin(ks[2], ks[3], hidden, hidden)
    w3, b3 = lin(ks[4], ks[5], hidden, out_dim)
    return (w1, b1, w2, b2, w3, b3)


def mlp_reference(x, params):
    w1, b1, w2, b2, w3, b3 = params
    dot = lambda a, b: jnp.dot(a, b, precision=jax.lax.Precision.HIGHEST)
    h1 = jnp.maximum(dot(x, w1) + b1, 0.0)
    h2 = jnp.maximum(dot(h1, w2) + b2, 0.0)
    return dot(h2, w3) + b3


if __name__ == "__main__":
    key = jax.random.PRNGKey(0)
    kx, kp = jax.random.split(key)

    input_dim = 32
    params = init_params(kp, input_dim)

    # 1) Tiny batch, f32 compute path (single grid step, batch padded to 128),
    #    tight tolerance.
    x_small = jax.random.normal(kx, (8, input_dim), jnp.float32)
    out_small = jax.block_until_ready(
        mlp_forward(x_small, params, compute_dtype=jnp.float32))
    ref_small = mlp_reference(x_small, params)
    assert out_small.shape == (8, 1), out_small.shape
    assert jnp.allclose(out_small, ref_small, atol=1e-3, rtol=1e-3), "f32 mismatch"

    # 2) Medium batch, bf16 MXU path: 2 grid steps (tile_b -> 256), ragged
    #    tail block (300 rows, no x padding), lane-dense output.
    kx2 = jax.random.fold_in(kx, 1)
    x_mid = jax.random.normal(kx2, (300, input_dim), jnp.float32)
    out_mid = jax.block_until_ready(
        mlp_forward(x_mid, params, tile_b=256, compute_dtype=jnp.bfloat16))
    ref_mid = mlp_reference(x_mid, params)
    assert out_mid.shape == (300, 1), out_mid.shape
    assert jnp.allclose(out_mid, ref_mid, atol=1e-1, rtol=1e-1), "bf16 mismatch"

    # 3) Larger batch with the default (large) tile: exercises the >=2-step
    #    megacore-friendly tile selection and an unpadded ragged tail.
    kx3 = jax.random.fold_in(kx, 2)
    x_big = jax.random.normal(kx3, (2500, input_dim), jnp.float32)
    out_big = jax.block_until_ready(
        mlp_forward(x_big, params, compute_dtype=jnp.bfloat16))
    ref_big = mlp_reference(x_big, params)
    assert out_big.shape == (2500, 1), out_big.shape
    assert jnp.allclose(out_big, ref_big, atol=1e-1, rtol=1e-1), "bf16 big mismatch"

    print("KERNEL_OK")
</pallas_src>

<mosaic_0001>
module attributes {stable_mosaic.version = 11 : i64} {
  func.func @mlp_kernel(%arg0: i32, %arg1: memref<128x32xf32, #tpu.memory_space<vmem>>, %arg2: memref<32x128xf32, #tpu.memory_space<vmem>>, %arg3: memref<1x128xf32, #tpu.memory_space<vmem>>, %arg4: memref<128x128xf32, #tpu.memory_space<vmem>>, %arg5: memref<1x128xf32, #tpu.memory_space<vmem>>, %arg6: memref<1x128xf32, #tpu.memory_space<vmem>>, %arg7: memref<1x1xf32, #tpu.memory_space<smem>>, %arg8: memref<1x128xf32, #tpu.memory_space<vmem>>) attributes {dimension_semantics = [#tpu.dimension_semantics<parallel>], iteration_bounds = array<i64: 1>, scalar_prefetch = 0 : i64, scratch_operands = 0 : i64, tpu.core_type = #tpu.core_type<tc>, window_params = [{transform_indices = @transform_0, window_bounds = array<i64: 128, 32>}, {pipeline_mode = #tpu.pipeline_mode<synchronous>, transform_indices = @transform_1, window_bounds = array<i64: 32, 128>}, {pipeline_mode = #tpu.pipeline_mode<synchronous>, transform_indices = @transform_2, window_bounds = array<i64: 1, 128>}, {pipeline_mode = #tpu.pipeline_mode<synchronous>, transform_indices = @transform_3, window_bounds = array<i64: 128, 128>}, {pipeline_mode = #tpu.pipeline_mode<synchronous>, transform_indices = @transform_4, window_bounds = array<i64: 1, 128>}, {pipeline_mode = #tpu.pipeline_mode<synchronous>, transform_indices = @transform_5, window_bounds = array<i64: 1, 128>}, {transform_indices = @transform_6, window_bounds = array<i64: 1, 1>}, {transform_indices = @transform_7, window_bounds = array<i64: 1, 128>}]} {
    %c0 = arith.constant 0 : index
    %c0_0 = arith.constant 0 : index
    %0 = vector.load %arg1[%c0, %c0_0] : memref<128x32xf32, #tpu.memory_space<vmem>>, vector<128x32xf32>
    %c0_1 = arith.constant 0 : index
    %c0_2 = arith.constant 0 : index
    %1 = vector.load %arg2[%c0_1, %c0_2] : memref<32x128xf32, #tpu.memory_space<vmem>>, vector<32x128xf32>
    %cst = arith.constant dense<0.000000e+00> : vector<128x128xf32>
    %2 = tpu.matmul %0, %1, %cst {dimension_numbers = #tpu.dot_dimension_numbers<[1], [0], [0], [1], [0, 0, 1, 1], [], []>} : vector<128x32xf32>, vector<32x128xf32>, vector<128x128xf32> -> vector<128x128xf32>
    %c0_3 = arith.constant 0 : index
    %c0_4 = arith.constant 0 : index
    %3 = vector.load %arg3[%c0_3, %c0_4] : memref<1x128xf32, #tpu.memory_space<vmem>>, vector<1x128xf32>
    %4 = vector.broadcast %3 : vector<1x128xf32> to vector<128x128xf32>
    %5 = arith.addf %2, %4 : vector<128x128xf32>
    %cst_5 = arith.constant 0.000000e+00 : f32
    %6 = vector.broadcast %cst_5 : f32 to vector<128x128xf32>
    %7 = arith.maximumf %5, %6 : vector<128x128xf32>
    %c0_6 = arith.constant 0 : index
    %c0_7 = arith.constant 0 : index
    %8 = vector.load %arg4[%c0_6, %c0_7] : memref<128x128xf32, #tpu.memory_space<vmem>>, vector<128x128xf32>
    %cst_8 = arith.constant dense<0.000000e+00> : vector<128x128xf32>
    %9 = tpu.matmul %7, %8, %cst_8 {dimension_numbers = #tpu.dot_dimension_numbers<[1], [0], [0], [1], [0, 0, 1, 1], [], []>} : vector<128x128xf32>, vector<128x128xf32>, vector<128x128xf32> -> vector<128x128xf32>
    %c0_9 = arith.constant 0 : index
    %c0_10 = arith.constant 0 : index
    %10 = vector.load %arg5[%c0_9, %c0_10] : memref<1x128xf32, #tpu.memory_space<vmem>>, vector<1x128xf32>
    %11 = vector.broadcast %10 : vector<1x128xf32> to vector<128x128xf32>
    %12 = arith.addf %9, %11 : vector<128x128xf32>
    %cst_11 = arith.constant 0.000000e+00 : f32
    %13 = vector.broadcast %cst_11 : f32 to vector<128x128xf32>
    %14 = arith.maximumf %12, %13 : vector<128x128xf32>
    %c0_12 = arith.constant 0 : index
    %c0_13 = arith.constant 0 : index
    %15 = vector.load %arg6[%c0_12, %c0_13] : memref<1x128xf32, #tpu.memory_space<vmem>>, vector<1x128xf32>
    %cst_14 = arith.constant dense<0.000000e+00> : vector<1x128xf32>
    %16 = tpu.matmul %15, %14, %cst_14 {dimension_numbers = #tpu.dot_dimension_numbers<[1], [1], [0], [0], [0, 0, 1, 0], [], []>} : vector<1x128xf32>, vector<128x128xf32>, vector<1x128xf32> -> vector<1x128xf32>
    %c0_15 = arith.constant 0 : index
    %c0_16 = arith.constant 0 : index
    %17 = memref.load %arg7[%c0_15, %c0_16] : memref<1x1xf32, #tpu.memory_space<smem>>
    %18 = vector.broadcast %17 : f32 to vector<1x128xf32>
    %19 = arith.addf %16, %18 : vector<1x128xf32>
    %c0_17 = arith.constant 0 : index
    %c0_18 = arith.constant 0 : index
    %20 = vector.load %arg8[%c0_17, %c0_18] : memref<1x128xf32, #tpu.memory_space<vmem>>, vector<1x128xf32>
    tpu.vector_store %arg8[%c0_17, %c0_18], %19 {strides = array<i32>} : memref<1x128xf32, #tpu.memory_space<vmem>>, vector<1x128xf32>,
    return
  }
  func.func @transform_0(%arg0: i32) -> (i32, i32) {
    %c0_i32 = arith.constant 0 : i32
    %c0_i32_0 = arith.constant 0 : i32
    return %arg0, %c0_i32 : i32, i32
  }
  func.func @transform_1(%arg0: i32) -> (i32, i32) {
    %c0_i32 = arith.constant 0 : i32
    %c0_i32_0 = arith.constant 0 : i32
    %c0_i32_1 = arith.constant 0 : i32
    return %c0_i32, %c0_i32_0 : i32, i32
  }
  func.func @transform_2(%arg0: i32) -> (i32, i32) {
    %c0_i32 = arith.constant 0 : i32
    %c0_i32_0 = arith.constant 0 : i32
    %c0_i32_1 = arith.constant 0 : i32
    return %c0_i32, %c0_i32_0 : i32, i32
  }
  func.func @transform_3(%arg0: i32) -> (i32, i32) {
    %c0_i32 = arith.constant 0 : i32
    %c0_i32_0 = arith.constant 0 : i32
    %c0_i32_1 = arith.constant 0 : i32
    return %c0_i32, %c0_i32_0 : i32, i32
  }
  func.func @transform_4(%arg0: i32) -> (i32, i32) {
    %c0_i32 = arith.constant 0 : i32
    %c0_i32_0 = arith.constant 0 : i32
    %c0_i32_1 = arith.constant 0 : i32
    return %c0_i32, %c0_i32_0 : i32, i32
  }
  func.func @transform_5(%arg0: i32) -> (i32, i32) {
    %c0_i32 = arith.constant 0 : i32
    %c0_i32_0 = arith.constant 0 : i32
    %c0_i32_1 = arith.constant 0 : i32
    return %c0_i32, %c0_i32_0 : i32, i32
  }
  func.func @transform_6(%arg0: i32) -> (i32, i32) {
    %c0_i32 = arith.constant 0 : i32
    %c0_i32_0 = arith.constant 0 : i32
    %c0_i32_1 = arith.constant 0 : i32
    return %c0_i32, %c0_i32_0 : i32, i32
  }
  func.func @transform_7(%arg0: i32) -> (i32, i32) {
    %c0_i32 = arith.constant 0 : i32
    %c0_i32_0 = arith.constant 0 : i32
    return %c0_i32, %arg0 : i32, i32
  }
}

</mosaic_0001>

<bundles_post_ra>
// kernel: tpu_custom_call.1
= control target key start
LH: loop header
LB: loop body
LE: loop exit
PB: predicated region body
PF: predicated region fallthrough
CT: control target
= control target key end

     0   :  { %vm55_vm0 = vcmask 261120   ;;  %s1039_s0 = inlined_call_operand.vmem [shape: f32[128,32], index: 0, kind: input, shape index: {}]   ;;  %s1040_s1 = inlined_call_operand.vmem [shape: f32[32,128], index: 1, kind: input, shape index: {}]   ;;  %s1041_s2 = inlined_call_operand.vmem [shape: f32[1,128], index: 2, kind: input, shape index: {}]   ;;  %s1042_s3 = inlined_call_operand.vmem [shape: f32[128,128], index: 3, kind: input, shape index: {}]   ;;  %s1043_s4 = inlined_call_operand.vmem [shape: f32[1,128], index: 4, kind: input, shape index: {}]   ;;  %s1044_s5 = inlined_call_operand.vmem [shape: f32[1,128], index: 5, kind: input, shape index: {}]   ;;  %s1045_s6 = inlined_call_operand.<no memory space> [shape: f32[1,1], index: 6, kind: input, shape index: {}]   ;;  %s1046_s7 = inlined_call_operand.hbm [shape: f32[1,128], index: 7, kind: output, shape index: {}]  }
   0x1   :  { %v44_v0 = vld [vmem:[%s1040_s1] sm:$0xff]  ;;  %v45_v1 = vld [vmem:[%s1040_s1 + $0x8] sm:$0xff]  ;;  %v46_v2 = vld [vmem:[%s1040_s1 + $0x10] sm:$0xff] }
   0x2   :  { %v747_v3 = vpack.c.bf16 %v45_v1, %v44_v0  ;;  %v47_v4 = vld [vmem:[%s1040_s1 + $0x18] sm:$0xff]  ;;  %v28_v5 = vld [vmem:[%s1039_s0] sm:$0xff]  ;;  %v266_v8 = vld [vmem:[%s1042_s3 + $0x8] sm:$0xff] }
   0x3   :  { %v751_v6 = vpack.c.bf16 %v47_v4, %v46_v2  ;;  %632 = vmatprep.mubr.msk.f32.mxu1 %vm55_vm0, %v28_v5  ;;  %v265_v7 = vld [vmem:[%s1042_s3] sm:$0xff]  ;;  %v267_v9 = vld [vmem:[%s1042_s3 + $0x10] sm:$0xff]  ;;  %v268_v10 = vld [vmem:[%s1042_s3 + $0x18] sm:$0xff] }
   0x4   :  { %748 = vmatprep.subr.bf16.mxu1 %v747_v3  ;;  %v29_v11 = vld [vmem:[%s1039_s0 + $0x8] sm:$0xff]  ;;  %v755_v12 = vpack.c.bf16 %v266_v8, %v265_v7  ;;  %v30_v13 = vld [vmem:[%s1039_s0 + $0x10] sm:$0xff]  ;;  %v759_v14 = vpack.c.bf16 %v268_v10, %v267_v9  ;;  %v269_v15 = vld [vmem:[%s1042_s3 + $0x20] sm:$0xff] }
   0x5   :  { %750 = vmatpush3.bf16.msra.mxu1 %v747_v3  ;;  %v270_v16 = vld [vmem:[%s1042_s3 + $0x28] sm:$0xff] }
   0x6   :  { %752 = vmatprep.subr.bf16.mxu1 %v751_v6 }
   0x9   :  { %754 = vmatpush3.bf16.msra.mxu1 %v751_v6 }
   0xa   :  { %756 = vmatprep.subr.bf16.mxu1 %v755_v12 }
   0xc   :  { %633 = vmatmul.mubr.msk.f32.vlgmr.msra.gmra.mrb[0].mxu1 %vm55_vm0, %v29_v11 }
   0xd   :  { %13 = vsyncpa [#allocation4], 0  ;;  %635 = vmatprep.mubr.msk.f32.mxu1 %vm55_vm0, %v30_v13  ;;  %v31_v17 = vld [vmem:[%s1039_s0 + $0x18] sm:$0xff]  ;;  %758 = vmatpush3.bf16.msra.mxu1 %v755_v12  ;;  %v32_v18 = vld [vmem:[%s1039_s0 + $0x20] sm:$0xff]  ;;  %v763_v19 = vpack.c.bf16 %v270_v16, %v269_v15  ;;  %vm840_vm1 = vmmov 0   ;;  %s842_s28 = smov [#allocation3]  }
   0xe   :  { %760 = vmatprep.subr.bf16.mxu1 %v759_v14  ;;  %v271_v20 = vld [vmem:[%s1042_s3 + $0x30] sm:$0xff]  ;;  %v272_v21 = vld [vmem:[%s1042_s3 + $0x38] sm:$0xff]  ;;  %v33_v22 = vld [vmem:[%s1039_s0 + $0x28] sm:$0xff]  ;;  %s529_s29 = sshll.u32 %s842_s28, 4  ;;  %s530_s29 = int_to_ptr.vmem [resolvable:$true] %s529_s29 }
   0xf   :  { %v34_v23 = vld [vmem:[%s1039_s0 + $0x30] sm:$0xff]  ;;  %v767_v24 = vpack.c.bf16 %v272_v21, %v271_v20  ;;  %v273_v25 = vld [vmem:[%s1042_s3 + $0x40] sm:$0xff]  ;;  %v274_v26 = vld [vmem:[%s1042_s3 + $0x48] sm:$0xff]  ;;  %s815_s30 = scalar_lea.vmem %s530_s29, 16  ;;  %s819_s8 = scalar_lea.vmem %s530_s29, 32 }
  0x10   :  { %636 = vmatmul.mubr.msk.f32.gmra.mrb[2].mxu1 %vm55_vm0, %v31_v17  ;;  %v35_v27 = vld [vmem:[%s1039_s0 + $0x38] sm:$0xff]  ;;  %v36_v28 = vld [vmem:[%s1039_s0 + $0x40] sm:$0xff]  ;;  %v771_v29 = vpack.c.bf16 %v274_v26, %v273_v25  ;;  %v275_v30 = vld [vmem:[%s1042_s3 + $0x50] sm:$0xff]  ;;  %p816_p0 = scmp.ne.s32.totalorder %s530_s29, %s815_s30  ;;  %p820_p1 = scmp.lt.s32.totalorder %s530_s29, %s530_s29 }
  0x11   :  { %638 = vmatprep.mubr.msk.f32.mxu1 %vm55_vm0, %v32_v18  ;;  %762 = vmatpush3.bf16.msra.mxu1 %v759_v14  ;;  %v276_v31 = vld [vmem:[%s1042_s3 + $0x58] sm:$0xff]  ;;  %v37_v32 = vld [vmem:[%s1039_s0 + $0x48] sm:$0xff]  ;;  %v38_v33 = vld [vmem:[%s1039_s0 + $0x50] sm:$0xff]  ;;  %p821_p2 = scmp.lt.s32.totalorder %s819_s8, %s815_s30 }
  0x12   :  { %764 = vmatprep.subr.bf16.mxu1 %v763_v19  ;;  %v775_v34 = vpack.c.bf16 %v276_v31, %v275_v30  ;;  %v277_v35 = vld [vmem:[%s1042_s3 + $0x60] sm:$0xff]  ;;  %v278_v36 = vld [vmem:[%s1042_s3 + $0x68] sm:$0xff]  ;;  %v39_v37 = vld [vmem:[%s1039_s0 + $0x58] sm:$0xff]  ;;  %v839_v31 = vmov 0.0|0.0  }
  0x13   :  { %v40_v38 = vld [vmem:[%s1039_s0 + $0x60] sm:$0xff]  ;;  %v779_v39 = vpack.c.bf16 %v278_v36, %v277_v35  ;;  %v41_v40 = vld [vmem:[%s1039_s0 + $0x68] sm:$0xff]  ;;  %v42_v41 = vld [vmem:[%s1039_s0 + $0x70] sm:$0xff]  ;;  %787 = vmatprep.subr.bf16.mxu0 %v839_v31  ;;  %p822_p3 = por %p821_p2, %p820_p1 }
  0x14   :  { %639 = vmatmul.mubr.msk.f32.gmra.mrb[4].mxu1 %vm55_vm0, %v33_v22  ;;  %v43_v42 = vld [vmem:[%s1039_s0 + $0x78] sm:$0xff]  ;;  %v279_v43 = vld [vmem:[%s1042_s3 + $0x70] sm:$0xff]  ;;  %v537_v46 = vld [vmem:[%s1041_s2] ss:$0 sm:$0xff] }
  0x15   :  { %641 = vmatprep.mubr.msk.f32.mxu1 %vm55_vm0, %v34_v23  ;;  %766 = vmatpush3.bf16.msra.mxu1 %v763_v19  ;;  %v280_v44 = vld [vmem:[%s1042_s3 + $0x78] sm:$0xff]  ;;  %p823_p4 = pnand %p822_p3, %p816_p0 }
  0x16   :  { %768 = vmatprep.subr.bf16.mxu1 %v767_v24  ;;  %v783_v45 = vpack.c.bf16 %v280_v44, %v279_v43 }
  0x18   :  { %642 = vmatmul.mubr.msk.f32.gmra.mrb[6].mxu1 %vm55_vm0, %v35_v27 }
  0x19   :  { %644 = vmatprep.mubr.msk.f32.mxu1 %vm55_vm0, %v36_v28  ;;  %770 = vmatpush3.bf16.msra.mxu1 %v767_v24 }
  0x1a   :  { %772 = vmatprep.subr.bf16.mxu1 %v771_v29 }
  0x1c   :  { %645 = vmatmul.mubr.msk.f32.gmra.mrb[8].mxu1 %vm55_vm0, %v37_v32  ;;  %v841_v32 = vmov 0.0  }
  0x1d   :  { %647 = vmatprep.mubr.msk.f32.mxu1 %vm55_vm0, %v38_v33  ;;  %774 = vmatpush3.bf16.msra.mxu1 %v771_v29  ;;  %v554_v33 = vld [vmem:[%s1043_s4] ss:$0 sm:$0xff] }
  0x1e   :  { %776 = vmatprep.subr.bf16.mxu1 %v775_v34  ;;  %744 = vmatprep.mubr.msk.f32.mxu0 %vm840_vm1, %v841_v32 }
  0x20   :  { %648 = vmatmul.mubr.msk.f32.gmra.mrb[10].mxu1 %vm55_vm0, %v39_v37 }
  0x21   :  { %650 = vmatprep.mubr.msk.f32.mxu1 %vm55_vm0, %v40_v38  ;;  %778 = vmatpush3.bf16.msra.mxu1 %v775_v34 }
  0x22   :  { %780 = vmatprep.subr.bf16.mxu1 %v779_v39 }
  0x24   :  { %651 = vmatmul.mubr.msk.f32.gmra.mrb[12].mxu1 %vm55_vm0, %v41_v40 }
  0x25   :  { %653 = vmatprep.mubr.msk.f32.mxu1 %vm55_vm0, %v42_v41  ;;  %782 = vmatpush3.bf16.msra.mxu1 %v779_v39 }
  0x26   :  { %784 = vmatprep.subr.bf16.mxu1 %v783_v45 }
  0x28   :  { %654 = vmatmul.mubr.msk.f32.gmra.mrb[14].mxu1 %vm55_vm0, %v43_v42 }
  0x29   :  { %786 = vmatpush3.bf16.msra.mxu1 %v783_v45 }
  0xdf   :  { %v634_v47 = vpop.f32.mrb[0].mxu1 }
  0xe0   :  { %v176_v48 = vadd.f32 %v634_v47, %v537_v46  ;;  %v170_v49 = vpop.f32.mrb[1].mxu1 }
  0xe1   :  { %v171_v50 = vadd.f32 %v537_v46, %v170_v49 }
  0xe2   :  { %v250_v53 = vmax.f32 %v176_v48, 0.0 }
  0xe3   :  { %v249_v51 = vmax.f32 %v171_v50, 0.0  ;;  %v637_v52 = vpop.f32.mrb[2].mxu1 }
  0xe4   :  { %v186_v54 = vadd.f32 %v637_v52, %v537_v46  ;;  %v180_v55 = vpop.f32.mrb[3].mxu1 }
  0xe5   :  { %v181_v56 = vadd.f32 %v537_v46, %v180_v55  ;;  %688 = vmatprep.mubr.f32.mxu1 %v249_v51 }
  0xe6   :  { %v252_v57 = vmax.f32 %v186_v54, 0.0  ;;  %689 = vmatmul.mubr.f32.vlgmr.msra.gmra.mrb[16].mxu1 %v250_v53 }
  0xe7   :  { %v251_v58 = vmax.f32 %v181_v56, 0.0  ;;  %v640_v59 = vpop.f32.mrb[4].mxu1 }
  0xe8   :  { %v196_v60 = vadd.f32 %v640_v59, %v537_v46  ;;  %v190_v61 = vpop.f32.mrb[5].mxu1 }
  0xe9   :  { %691 = vmatprep.mubr.f32.mxu1 %v251_v58  ;;  %v191_v62 = vadd.f32 %v537_v46, %v190_v61 }
  0xea   :  { %692 = vmatmul.mubr.f32.gmra.mrb[18].mxu1 %v252_v57  ;;  %v254_v63 = vmax.f32 %v196_v60, 0.0 }
  0xeb   :  { %v253_v0 = vmax.f32 %v191_v62, 0.0  ;;  %v643_v1 = vpop.f32.mrb[6].mxu1 }
  0xec   :  { %v206_v2 = vadd.f32 %v643_v1, %v537_v46  ;;  %v200_v3 = vpop.f32.mrb[7].mxu1 }
  0xed   :  { %694 = vmatprep.mubr.f32.mxu1 %v253_v0  ;;  %v201_v4 = vadd.f32 %v537_v46, %v200_v3 }
  0xee   :  { %695 = vmatmul.mubr.f32.gmra.mrb[20].mxu1 %v254_v63  ;;  %v256_v5 = vmax.f32 %v206_v2, 0.0 }
  0xef   :  { %v255_v6 = vmax.f32 %v201_v4, 0.0  ;;  %v646_v7 = vpop.f32.mrb[8].mxu1 }
  0xf0   :  { %v216_v8 = vadd.f32 %v646_v7, %v537_v46  ;;  %v210_v9 = vpop.f32.mrb[9].mxu1 }
  0xf1   :  { %697 = vmatprep.mubr.f32.mxu1 %v255_v6  ;;  %v211_v10 = vadd.f32 %v537_v46, %v210_v9 }
  0xf2   :  { %698 = vmatmul.mubr.f32.gmra.mrb[22].mxu1 %v256_v5  ;;  %v258_v11 = vmax.f32 %v216_v8, 0.0 }
  0xf3   :  { %v257_v12 = vmax.f32 %v211_v10, 0.0  ;;  %v649_v13 = vpop.f32.mrb[10].mxu1 }
  0xf4   :  { %v226_v14 = vadd.f32 %v649_v13, %v537_v46  ;;  %v220_v15 = vpop.f32.mrb[11].mxu1 }
  0xf5   :  { %700 = vmatprep.mubr.f32.mxu1 %v257_v12  ;;  %v221_v16 = vadd.f32 %v537_v46, %v220_v15 }
  0xf6   :  { %701 = vmatmul.mubr.f32.gmra.mrb[24].mxu1 %v258_v11  ;;  %v260_v17 = vmax.f32 %v226_v14, 0.0 }
  0xf7   :  { %v259_v18 = vmax.f32 %v221_v16, 0.0  ;;  %v652_v19 = vpop.f32.mrb[12].mxu1 }
  0xf8   :  { %v236_v20 = vadd.f32 %v652_v19, %v537_v46  ;;  %v230_v21 = vpop.f32.mrb[13].mxu1 }
  0xf9   :  { %703 = vmatprep.mubr.f32.mxu1 %v259_v18  ;;  %v231_v22 = vadd.f32 %v537_v46, %v230_v21 }
  0xfa   :  { %704 = vmatmul.mubr.f32.gmra.mrb[26].mxu1 %v260_v17  ;;  %v262_v23 = vmax.f32 %v236_v20, 0.0 }
  0xfb   :  { %v261_v24 = vmax.f32 %v231_v22, 0.0  ;;  %v655_v25 = vpop.f32.mrb[14].mxu1 }
  0xfc   :  { %v246_v26 = vadd.f32 %v655_v25, %v537_v46  ;;  %v240_v27 = vpop.f32.mrb[15].mxu1 }
  0xfd   :  { %706 = vmatprep.mubr.f32.mxu1 %v261_v24  ;;  %v241_v28 = vadd.f32 %v537_v46, %v240_v27  ;;  %v451_v27 = vstv %s1045_s6 }
  0xfe   :  { %707 = vmatmul.mubr.f32.gmra.mrb[28].mxu1 %v262_v23  ;;  %v264_v29 = vmax.f32 %v246_v26, 0.0  ;;  %v449_v26 = vld [vmem:[%s1044_s5] sm:$0x1] }
  0xff   :  { %v263_v30 = vmax.f32 %v241_v28, 0.0 }
 0x101   :  { %709 = vmatprep.mubr.f32.mxu1 %v263_v30 }
 0x102   :  { %710 = vmatmul.mubr.f32.gmra.mrb[30].mxu1 %v264_v29 }
 0x1b9   :  { %v690_v34 = vpop.f32.mrb[16].mxu1 }
 0x1ba   :  { %v360_v35 = vadd.f32 %v690_v34, %v554_v33  ;;  %v354_v36 = vpop.f32.mrb[17].mxu1 }
 0x1bb   :  { %v355_v37 = vadd.f32 %v554_v33, %v354_v36 }
 0x1bc   :  { %v434_v38 = vmax.f32 %v360_v35, 0.0 }
 0x1bd   :  { %v433_v39 = vmax.f32 %v355_v37, 0.0  ;;  %v693_v40 = vpop.f32.mrb[18].mxu1 }
 0x1be   :  { %v370_v41 = vadd.f32 %v693_v40, %v554_v33  ;;  %v364_v42 = vpop.f32.mrb[19].mxu1 }
 0x1bf   :  { %v365_v43 = vadd.f32 %v554_v33, %v364_v42  ;;  %v788_v44 = vpack.c.bf16 %v434_v38, %v433_v39 }
 0x1c0   :  { %v436_v45 = vmax.f32 %v370_v41, 0.0 }
 0x1c1   :  { %v435_v46 = vmax.f32 %v365_v43, 0.0  ;;  %789 = vmatpush3.bf16.xpose.msra.mxu0 %v788_v44  ;;  %v696_v47 = vpop.f32.mrb[20].mxu1 }
 0x1c2   :  { %v380_v48 = vadd.f32 %v696_v47, %v554_v33  ;;  %v374_v49 = vpop.f32.mrb[21].mxu1  ;;  %790 = vmatprep.subr.bf16.mxu0 %v839_v31 }
 0x1c3   :  { %v791_v50 = vpack.c.bf16 %v436_v45, %v435_v46  ;;  %v375_v51 = vadd.f32 %v554_v33, %v374_v49 }
 0x1c4   :  { %v438_v52 = vmax.f32 %v380_v48, 0.0 }
 0x1c5   :  { %v437_v53 = vmax.f32 %v375_v51, 0.0  ;;  %v699_v54 = vpop.f32.mrb[22].mxu1 }
 0x1c6   :  { %v390_v55 = vadd.f32 %v699_v54, %v554_v33  ;;  %v384_v56 = vpop.f32.mrb[23].mxu1 }
 0x1c7   :  { %v794_v57 = vpack.c.bf16 %v438_v52, %v437_v53  ;;  %v385_v58 = vadd.f32 %v554_v33, %v384_v56 }
 0x1c8   :  { %v440_v59 = vmax.f32 %v390_v55, 0.0 }
 0x1c9   :  { %792 = vmatpush3.bf16.xpose.msra.mxu0 %v791_v50  ;;  %v439_v60 = vmax.f32 %v385_v58, 0.0  ;;  %v702_v61 = vpop.f32.mrb[24].mxu1 }
 0x1ca   :  { %793 = vmatprep.subr.bf16.mxu0 %v839_v31  ;;  %v400_v62 = vadd.f32 %v702_v61, %v554_v33  ;;  %v394_v63 = vpop.f32.mrb[25].mxu1 }
 0x1cb   :  { %v797_v0 = vpack.c.bf16 %v440_v59, %v439_v60  ;;  %v395_v1 = vadd.f32 %v554_v33, %v394_v63 }
 0x1cc   :  { %v442_v2 = vmax.f32 %v400_v62, 0.0 }
 0x1cd   :  { %v441_v3 = vmax.f32 %v395_v1, 0.0  ;;  %v705_v4 = vpop.f32.mrb[26].mxu1 }
 0x1ce   :  { %v410_v5 = vadd.f32 %v705_v4, %v554_v33  ;;  %v404_v6 = vpop.f32.mrb[27].mxu1 }
 0x1cf   :  { %v800_v7 = vpack.c.bf16 %v442_v2, %v441_v3  ;;  %v405_v8 = vadd.f32 %v554_v33, %v404_v6 }
 0x1d0   :  { %v444_v9 = vmax.f32 %v410_v5, 0.0 }
 0x1d1   :  { %795 = vmatpush3.bf16.xpose.msra.mxu0 %v794_v57  ;;  %v443_v10 = vmax.f32 %v405_v8, 0.0  ;;  %v708_v11 = vpop.f32.mrb[28].mxu1 }
 0x1d2   :  { %796 = vmatprep.subr.bf16.mxu0 %v839_v31  ;;  %v420_v12 = vadd.f32 %v708_v11, %v554_v33  ;;  %v414_v13 = vpop.f32.mrb[29].mxu1 }
 0x1d3   :  { %v803_v14 = vpack.c.bf16 %v444_v9, %v443_v10  ;;  %v415_v15 = vadd.f32 %v554_v33, %v414_v13 }
 0x1d4   :  { %v446_v16 = vmax.f32 %v420_v12, 0.0 }
 0x1d5   :  { %v445_v17 = vmax.f32 %v415_v15, 0.0  ;;  %v711_v18 = vpop.f32.mrb[30].mxu1 }
 0x1d6   :  { %v430_v19 = vadd.f32 %v711_v18, %v554_v33  ;;  %v424_v20 = vpop.f32.mrb[31].mxu1 }
 0x1d7   :  { %v806_v21 = vpack.c.bf16 %v446_v16, %v445_v17  ;;  %v425_v22 = vadd.f32 %v554_v33, %v424_v20 }
 0x1d8   :  { %v448_v23 = vmax.f32 %v430_v19, 0.0 }
 0x1d9   :  { %798 = vmatpush3.bf16.xpose.msra.mxu0 %v797_v0  ;;  %v447_v24 = vmax.f32 %v425_v22, 0.0 }
 0x1da   :  { %799 = vmatprep.subr.bf16.mxu0 %v839_v31 }
 0x1db   :  { %v809_v25 = vpack.c.bf16 %v448_v23, %v447_v24 }
 0x1e1   :  { %801 = vmatpush3.bf16.xpose.msra.mxu0 %v800_v7 }
 0x1e2   :  { %802 = vmatprep.subr.bf16.mxu0 %v839_v31 }
 0x1e9   :  { %804 = vmatpush3.bf16.xpose.msra.mxu0 %v803_v14 }
 0x1ea   :  { %805 = vmatprep.subr.bf16.mxu0 %v839_v31 }
 0x1f1   :  { %807 = vmatpush3.bf16.xpose.msra.mxu0 %v806_v21 }
 0x1f2   :  { %808 = vmatprep.subr.bf16.mxu0 %v839_v31 }
 0x1f9   :  { %810 = vmatpush3.bf16.xpose.msra.mxu0 %v809_v25 }
 0x200   :  { %745 = vmatmul.mubr.f32.vlgmr.msra.gmra.mrb[0].mxu0 %v449_v26 }
 0x2d3   :  { %v518_v28 = vpop.f32.mrb[0].mxu0 }
 0x2d4   :  { %v519_v29 = vadd.f32 %v518_v28, %v451_v27  ;;  %v746_v30 = vpop.f32.mrb[1].mxu0 }
 0x2d6   :  { %522 = vst [vmem:[#allocation3] sm:$0x1] %v519_v29 }
 0x2d7   :  { %826 = shalt.err (!%p823_p4)
}
 0x2d8   :  { %s827_s10 = scalar_lea.hbm %s1046_s7, 16 }
 0x2d9   :  { %p828_p5 = scmp.ne.s32.totalorder %s1046_s7, %s827_s10  ;;  %p831_p6 = scmp.lt.u32.totalorder %s827_s10, %s1046_s7 }
 0x2db   :  { %p833_p7 = pnand %p831_p6, %p828_p5 }
 0x2dd   :  { %836 = shalt.err (!%p833_p7)
}
 0x2de   :  { %532 = dma.vmem_to_hbm [thread:$0]  %s530_s29, 16, %s1046_s7, [#allocation4]  }
 0x2df   :  { %837 = dma.done.wait [#allocation4], 16  }
 0x2e0   :  { %838 = vsyncadd [#allocation4], 4294967280 }
 0x2e1   :  { %536 = vsyncpa [#allocation4], 1 }

</bundles_post_ra>
